<compile_context>
chip_gen: v5e
topology: v5e:2x2
jax: 0.10.0
libtpu: 0.0.40
codegen_flags: <defaults>
</compile_context>

<pallas_src>
import functools
import math

import jax
import jax.numpy as jnp
from jax import lax
from jax.experimental import pallas as pl
from jax.experimental.pallas import tpu as pltpu


def _round_up(a, m):
    return (a + m - 1) // m * m


# ---------------------------------------------------------------------------
# Kernel 1: fused QKV projection (three 1x1 convs == one channel matmul)
# ---------------------------------------------------------------------------
def _qkv_proj_kernel(cq_p, w_ref, b_ref, x_ref, q_ref, k_ref, v_ref):
    x = x_ref[0].astype(jnp.bfloat16)                         # (Cp, tn)
    # bf16 operands, f32 accumulation on the MXU; bias added in f32.
    qkv = jnp.dot(w_ref[...], x, preferred_element_type=jnp.float32)
    qkv = (qkv + b_ref[...]).astype(jnp.bfloat16)             # (Ct, tn)
    q_ref[0] = qkv[0:cq_p]
    k_ref[0] = qkv[cq_p:2 * cq_p]
    v_ref[0] = qkv[2 * cq_p:]


# ---------------------------------------------------------------------------
# Kernel 2: flash attention (online softmax) + gamma * out + x residual
#   All tensors keep channels on sublanes and N on lanes — no transposes.
# ---------------------------------------------------------------------------
def _flash_attn_kernel(n_actual, k_tile,
                       gamma_ref, q_ref, k_ref, v_ref, xr_ref, o_ref,
                       m_sc, l_sc, acc_sc):
    ki = pl.program_id(2)

    @pl.when(ki == 0)
    def _():
        m_sc[...] = jnp.full_like(m_sc, -jnp.inf)
        l_sc[...] = jnp.zeros_like(l_sc)
        acc_sc[...] = jnp.zeros_like(acc_sc)

    q = q_ref[0]                                              # (Cq_p, tq) bf16
    k = k_ref[0]                                              # (Cq_p, tk) bf16
    # s[j, i] = sum_c k[c, j] * q[c, i]  == energy[i, j]; keys live on sublanes,
    # queries on lanes.  Contract the channel axis — no N x N transpose ever.
    s = lax.dot_general(k, q, (((0,), (0,)), ((), ())),
                        preferred_element_type=jnp.float32)   # (tk, tq) f32

    # Mask padded key rows so they don't leak into the softmax denominator.
    row = ki * k_tile + lax.broadcasted_iota(jnp.int32, s.shape, 0)
    s = jnp.where(row < n_actual, s, -1e30)

    m_prev = m_sc[...]                                        # (1, tq)
    m_new = jnp.maximum(m_prev, jnp.max(s, axis=0, keepdims=True))
    alpha = jnp.exp(m_prev - m_new)                           # (1, tq) f32
    p = jnp.exp(s - m_new)                                    # (tk, tq) f32
    l_sc[...] = alpha * l_sc[...] + jnp.sum(p, axis=0, keepdims=True)
    # out[c, i] += sum_j v[c, j] * p[j, i]; output is (C_out_p, tq) — only
    # C_out_p MXU row-streams per k-tile and the accumulator stays lane-dense.
    pv = lax.dot_general(v_ref[0], p.astype(jnp.bfloat16),
                         (((1,), (0,)), ((), ())),
                         preferred_element_type=jnp.float32)  # (Co_p, tq)
    acc_sc[...] = alpha * acc_sc[...] + pv
    m_sc[...] = m_new

    @pl.when(ki == pl.num_programs(2) - 1)
    def _():
        inv_l = pl.reciprocal(l_sc[...], approx=True)         # (1, tq), EUP
        scale = gamma_ref[0, 0] * inv_l                       # fold gamma into 1/l
        # Lane-dense store along N, no transpose needed.
        o_ref[0] = (acc_sc[...] * scale + xr_ref[0]).astype(o_ref.dtype)


# ---------------------------------------------------------------------------
# Wrapper
# ---------------------------------------------------------------------------
def self_attn(x, params, *, q_tile=256, k_tile=512):
    """x: (B, C, W, H) float32 (NCHW, same as PyTorch). Returns gamma*attn(x) + x."""
    wq, bq, wk, bk, wv, bv, gamma = params
    B, C, W, H = x.shape
    N = W * H
    Cq = wq.shape[0]
    Co = wv.shape[0]
    assert Co == C, "out_dim must equal in_dim for the residual (matches torch .view)"

    # --- padding / tiling ---------------------------------------------------
    n128 = _round_up(N, 128)                 # lane alignment
    tk = min(k_tile, n128)
    tq = min(q_tile, n128)
    Np = _round_up(N, math.lcm(tq, tk))      # both tile sizes divide Np
    SUB = 16                                 # sublane pad (bf16 packing)
    Cp = _round_up(C, SUB)
    Cqp = _round_up(Cq, SUB)
    Cop = _round_up(Co, SUB)
    Ct = 2 * Cqp + Cop

    x2 = x.reshape(B, C, N).astype(jnp.float32)
    xp = jnp.zeros((B, Cp, Np), jnp.float32).at[:, :C, :N].set(x2)

    # Fused + zero-padded projection weights / biases [Wq; Wk; Wv].
    w_all = jnp.zeros((Ct, Cp), jnp.float32)
    w_all = w_all.at[0:Cq, :C].set(wq)
    w_all = w_all.at[Cqp:Cqp + Cq, :C].set(wk)
    w_all = w_all.at[2 * Cqp:2 * Cqp + Co, :C].set(wv)
    w_all = w_all.astype(jnp.bfloat16)
    b_all = jnp.zeros((Ct, 1), jnp.float32)
    b_all = b_all.at[0:Cq].set(bq)
    b_all = b_all.at[Cqp:Cqp + Cq].set(bk)
    b_all = b_all.at[2 * Cqp:2 * Cqp + Co].set(bv)

    gamma2 = jnp.asarray(gamma, jnp.float32).reshape(1, 1)

    # --- kernel 1: fused QKV projection --------------------------------------
    tn = tk
    q, k, v = pl.pallas_call(
        functools.partial(_qkv_proj_kernel, Cqp),
        out_shape=(
            jax.ShapeDtypeStruct((B, Cqp, Np), jnp.bfloat16),
            jax.ShapeDtypeStruct((B, Cqp, Np), jnp.bfloat16),
            jax.ShapeDtypeStruct((B, Cop, Np), jnp.bfloat16),
        ),
        grid=(B, Np // tn),
        in_specs=[
            pl.BlockSpec((Ct, Cp), lambda b, n: (0, 0)),        # fused weights (resident)
            pl.BlockSpec((Ct, 1), lambda b, n: (0, 0)),         # fused bias (resident)
            pl.BlockSpec((1, Cp, tn), lambda b, n: (b, 0, n)),  # x tile
        ],
        out_specs=(
            pl.BlockSpec((1, Cqp, tn), lambda b, n: (b, 0, n)),
            pl.BlockSpec((1, Cqp, tn), lambda b, n: (b, 0, n)),
            pl.BlockSpec((1, Cop, tn), lambda b, n: (b, 0, n)),
        ),
        compiler_params=pltpu.CompilerParams(
            dimension_semantics=("parallel", "parallel")),
    )(w_all, b_all, xp)

    # --- kernel 2: flash attention + residual --------------------------------
    out = pl.pallas_call(
        functools.partial(_flash_attn_kernel, N, tk),
        out_shape=jax.ShapeDtypeStruct((B, Cop, Np), jnp.float32),
        grid=(B, Np // tq, Np // tk),
        in_specs=[
            pl.BlockSpec(memory_space=pltpu.MemorySpace.SMEM),          # gamma (1,1)
            pl.BlockSpec((1, Cqp, tq), lambda b, qi, ki: (b, 0, qi)),   # Q tile
            pl.BlockSpec((1, Cqp, tk), lambda b, qi, ki: (b, 0, ki)),   # K tile
            pl.BlockSpec((1, Cop, tk), lambda b, qi, ki: (b, 0, ki)),   # V tile
            pl.BlockSpec((1, Cp, tq), lambda b, qi, ki: (b, 0, qi)),    # x tile (residual)
        ],
        out_specs=pl.BlockSpec((1, Cop, tq), lambda b, qi, ki: (b, 0, qi)),
        scratch_shapes=[
            pltpu.VMEM((1, tq), jnp.float32),    # running max   (queries on lanes)
            pltpu.VMEM((1, tq), jnp.float32),    # running sum
            pltpu.VMEM((Cop, tq), jnp.float32),  # output accumulator (lane-dense)
        ],
        compiler_params=pltpu.CompilerParams(
            dimension_semantics=("parallel", "parallel", "arbitrary")),
    )(gamma2, q, k, v, xp)

    return out[:, :C, :N].reshape(B, C, W, H)


# ---------------------------------------------------------------------------
# Pure-JAX reference mirroring the PyTorch forward (f32 throughout)
# ---------------------------------------------------------------------------
def ref_self_attn(x, params):
    wq, bq, wk, bk, wv, bv, gamma = params
    B, C, W, H = x.shape
    N = W * H
    x2 = x.reshape(B, C, N)
    q = jnp.einsum('oc,bcn->bon', wq, x2) + bq[None]          # (B, Cq, N)
    k = jnp.einsum('oc,bcn->bon', wk, x2) + bk[None]
    v = jnp.einsum('oc,bcn->bon', wv, x2) + bv[None]          # (B, Co, N)
    energy = jnp.einsum('bci,bcj->bij', q, k)                 # (B, N, N)
    attn = jax.nn.softmax(energy, axis=-1)
    out = jnp.einsum('bcj,bij->bci', v, attn)                 # (B, Co, N)
    out = gamma[0, 0] * out + x2
    return out.reshape(B, C, W, H)


def make_params(key, in_dim, out_dim):
    cq = in_dim // 8
    ks = jax.random.split(key, 6)
    scale = 0.1
    wq = scale * jax.random.normal(ks[0], (cq, in_dim), jnp.float32)
    bq = scale * jax.random.normal(ks[1], (cq, 1), jnp.float32)
    wk = scale * jax.random.normal(ks[2], (cq, in_dim), jnp.float32)
    bk = scale * jax.random.normal(ks[3], (cq, 1), jnp.float32)
    wv = scale * jax.random.normal(ks[4], (out_dim, in_dim), jnp.float32)
    bv = scale * jax.random.normal(ks[5], (out_dim, 1), jnp.float32)
    # PyTorch inits gamma to 0 (which would make out == x); use a nonzero value
    # so the attention path is actually exercised.
    gamma = jnp.full((1, 1), 0.5, jnp.float32)
    return (wq, bq, wk, bk, wv, bv, gamma)


if __name__ == "__main__":
    B, C, W, H = 2, 16, 8, 8           # in_dim=16 -> in_dim//8 = 2, out_dim=16
    key = jax.random.PRNGKey(0)
    kx, kp = jax.random.split(key)
    x = jax.random.normal(kx, (B, C, W, H), jnp.float32)
    params = make_params(kp, C, C)

    out = self_attn(x, params)
    out = jax.block_until_ready(out)

    ref = ref_self_attn(x, params)
    assert out.shape == (B, C, W, H)
    # bf16 MXU operands with f32 accumulation -> ~1e-3 abs error budget
    assert jnp.allclose(out, ref, atol=1e-2, rtol=1e-2), float(jnp.max(jnp.abs(out - ref)))

    print("KERNEL_OK")
</pallas_src>

<mosaic_0001>
module attributes {stable_mosaic.version = 11 : i64} {
  func.func @_qkv_proj_kernel(%arg0: i32, %arg1: i32, %arg2: memref<48x16xbf16, #tpu.memory_space<vmem>>, %arg3: memref<48x1xf32, #tpu.memory_space<vmem>>, %arg4: memref<1x16x128xf32, #tpu.memory_space<vmem>>, %arg5: memref<1x16x128xbf16, #tpu.memory_space<vmem>>, %arg6: memref<1x16x128xbf16, #tpu.memory_space<vmem>>, %arg7: memref<1x16x128xbf16, #tpu.memory_space<vmem>>) attributes {dimension_semantics = [#tpu.dimension_semantics<parallel>, #tpu.dimension_semantics<parallel>], iteration_bounds = array<i64: 2, 1>, scalar_prefetch = 0 : i64, scratch_operands = 0 : i64, tpu.core_type = #tpu.core_type<tc>, window_params = [{pipeline_mode = #tpu.pipeline_mode<synchronous>, transform_indices = @transform_0, window_bounds = array<i64: 48, 16>}, {pipeline_mode = #tpu.pipeline_mode<synchronous>, transform_indices = @transform_1, window_bounds = array<i64: 48, 1>}, {transform_indices = @transform_2, window_bounds = array<i64: 1, 16, 128>}, {transform_indices = @transform_3, window_bounds = array<i64: 1, 16, 128>}, {transform_indices = @transform_4, window_bounds = array<i64: 1, 16, 128>}, {transform_indices = @transform_5, window_bounds = array<i64: 1, 16, 128>}]} {
    %c0 = arith.constant 0 : index
    %c0_0 = arith.constant 0 : index
    %c0_1 = arith.constant 0 : index
    %0 = vector.load %arg4[%c0, %c0_0, %c0_1] : memref<1x16x128xf32, #tpu.memory_space<vmem>>, vector<1x16x128xf32>
    %1 = vector.shape_cast %0 : vector<1x16x128xf32> to vector<16x128xf32>
    %2 = arith.truncf %1 : vector<16x128xf32> to vector<16x128xbf16>
    %c0_2 = arith.constant 0 : index
    %c0_3 = arith.constant 0 : index
    %3 = vector.load %arg2[%c0_2, %c0_3] : memref<48x16xbf16, #tpu.memory_space<vmem>>, vector<48x16xbf16>
    %cst = arith.constant dense<0.000000e+00> : vector<48x128xf32>
    %4 = tpu.matmul %3, %2, %cst {dimension_numbers = #tpu.dot_dimension_numbers<[1], [0], [0], [1], [0, 0, 1, 1], [], []>} : vector<48x16xbf16>, vector<16x128xbf16>, vector<48x128xf32> -> vector<48x128xf32>
    %c0_4 = arith.constant 0 : index
    %c0_5 = arith.constant 0 : index
    %5 = vector.load %arg3[%c0_4, %c0_5] : memref<48x1xf32, #tpu.memory_space<vmem>>, vector<48x1xf32>
    %6 = vector.broadcast %5 : vector<48x1xf32> to vector<48x128xf32>
    %7 = arith.addf %4, %6 : vector<48x128xf32>
    %8 = arith.truncf %7 : vector<48x128xf32> to vector<48x128xbf16>
    %9 = vector.extract_strided_slice %8 {offsets = [0, 0], sizes = [16, 128], strides = [1, 1]} : vector<48x128xbf16> to vector<16x128xbf16>
    %c0_6 = arith.constant 0 : index
    %c0_7 = arith.constant 0 : index
    %c0_8 = arith.constant 0 : index
    %10 = vector.load %arg5[%c0_6, %c0_7, %c0_8] : memref<1x16x128xbf16, #tpu.memory_space<vmem>>, vector<1x16x128xbf16>
    %11 = vector.shape_cast %10 : vector<1x16x128xbf16> to vector<16x128xbf16>
    %12 = vector.shape_cast %9 : vector<16x128xbf16> to vector<1x16x128xbf16>
    tpu.vector_store %arg5[%c0_6, %c0_7, %c0_8], %12 {strides = array<i32>} : memref<1x16x128xbf16, #tpu.memory_space<vmem>>, vector<1x16x128xbf16>,
    %13 = vector.extract_strided_slice %8 {offsets = [16, 0], sizes = [16, 128], strides = [1, 1]} : vector<48x128xbf16> to vector<16x128xbf16>
    %c0_9 = arith.constant 0 : index
    %c0_10 = arith.constant 0 : index
    %c0_11 = arith.constant 0 : index
    %14 = vector.load %arg6[%c0_9, %c0_10, %c0_11] : memref<1x16x128xbf16, #tpu.memory_space<vmem>>, vector<1x16x128xbf16>
    %15 = vector.shape_cast %14 : vector<1x16x128xbf16> to vector<16x128xbf16>
    %16 = vector.shape_cast %13 : vector<16x128xbf16> to vector<1x16x128xbf16>
    tpu.vector_store %arg6[%c0_9, %c0_10, %c0_11], %16 {strides = array<i32>} : memref<1x16x128xbf16, #tpu.memory_space<vmem>>, vector<1x16x128xbf16>,
    %17 = vector.extract_strided_slice %8 {offsets = [32, 0], sizes = [16, 128], strides = [1, 1]} : vector<48x128xbf16> to vector<16x128xbf16>
    %c0_12 = arith.constant 0 : index
    %c0_13 = arith.constant 0 : index
    %c0_14 = arith.constant 0 : index
    %18 = vector.load %arg7[%c0_12, %c0_13, %c0_14] : memref<1x16x128xbf16, #tpu.memory_space<vmem>>, vector<1x16x128xbf16>
    %19 = vector.shape_cast %18 : vector<1x16x128xbf16> to vector<16x128xbf16>
    %20 = vector.shape_cast %17 : vector<16x128xbf16> to vector<1x16x128xbf16>
    tpu.vector_store %arg7[%c0_12, %c0_13, %c0_14], %20 {strides = array<i32>} : memref<1x16x128xbf16, #tpu.memory_space<vmem>>, vector<1x16x128xbf16>,
    return
  }
  func.func @transform_0(%arg0: i32, %arg1: i32) -> (i32, i32) {
    %c0_i32 = arith.constant 0 : i32
    %c0_i32_0 = arith.constant 0 : i32
    %c0_i32_1 = arith.constant 0 : i32
    return %c0_i32, %c0_i32_0 : i32, i32
  }
  func.func @transform_1(%arg0: i32, %arg1: i32) -> (i32, i32) {
    %c0_i32 = arith.constant 0 : i32
    %c0_i32_0 = arith.constant 0 : i32
    %c0_i32_1 = arith.constant 0 : i32
    return %c0_i32, %c0_i32_0 : i32, i32
  }
  func.func @transform_2(%arg0: i32, %arg1: i32) -> (i32, i32, i32) {
    %c0_i32 = arith.constant 0 : i32
    %c0_i32_0 = arith.constant 0 : i32
    return %arg0, %c0_i32, %arg1 : i32, i32, i32
  }
  func.func @transform_3(%arg0: i32, %arg1: i32) -> (i32, i32, i32) {
    %c0_i32 = arith.constant 0 : i32
    %c0_i32_0 = arith.constant 0 : i32
    return %arg0, %c0_i32, %arg1 : i32, i32, i32
  }
  func.func @transform_4(%arg0: i32, %arg1: i32) -> (i32, i32, i32) {
    %c0_i32 = arith.constant 0 : i32
    %c0_i32_0 = arith.constant 0 : i32
    return %arg0, %c0_i32, %arg1 : i32, i32, i32
  }
  func.func @transform_5(%arg0: i32, %arg1: i32) -> (i32, i32, i32) {
    %c0_i32 = arith.constant 0 : i32
    %c0_i32_0 = arith.constant 0 : i32
    return %arg0, %c0_i32, %arg1 : i32, i32, i32
  }
}

</mosaic_0001>

<bundles_post_ra>
// kernel: tpu_custom_call.1
= control target key start
LH: loop header
LB: loop body
LE: loop exit
PB: predicated region body
PF: predicated region fallthrough
CT: control target
= control target key end

     0   :  { %s1107_s0 = inlined_call_operand.vmem [shape: bf16[48,16], index: 0, kind: input, shape index: {}]   ;;  %s1108_s1 = inlined_call_operand.vmem [shape: f32[48,1], index: 1, kind: input, shape index: {}]   ;;  %s1109_s2 = inlined_call_operand.vmem [shape: f32[2,16,128], index: 2, kind: input, shape index: {}]   ;;  %s1110_s3 = inlined_call_operand.hbm [shape: bf16[2,16,128], index: 3, kind: output, shape index: {0}]   ;;  %s1111_s4 = inlined_call_operand.hbm [shape: bf16[2,16,128], index: 4, kind: output, shape index: {1}]   ;;  %s1112_s5 = inlined_call_operand.hbm [shape: bf16[2,16,128], index: 5, kind: output, shape index: {2}]  }
   0x1   :  { %1118 = sst [smem:[#allocation11_spill]] %s1107_s0 }
   0x2   :  { %1119 = sst [smem:[#allocation12_spill]] %s1108_s1 }
   0x3   :  { %1120 = sst [smem:[#allocation13_spill]] %s1109_s2 }
   0x4   :  { %1121 = sst [smem:[#allocation14_spill]] %s1111_s4 }
   0x5   :  { %11 = vsyncpa [#allocation3], 0 }
   0x6   :  { %13 = vsyncpa [#allocation3 + $0x1], 0 }
   0x7   :  { %14 = vsyncpa [#allocation5], 0 }
   0x8   :  { %16 = vsyncpa [#allocation5 + $0x1], 0  ;;  %s889_s18 = smov 0   ;;  %s891_s19 = smov 0  }
   0x9   :  { %s893_s20 = smov 0   ;;  %s895_s21 = smov 0  }
   0xa   :  { %s897_s22 = smov 0   ;;  %s899_s23 = smov 0  }
   0xb LB: > { %s585_s24 = sadd.s32 4294967295, %s854_s23   ;;  %s1113_s25 = sadd.s32 4294967294, %s854_s23   ;;  %s854_s23 = sphi %s899_s23, %s22_s23   ;;  %s850_s22 = sphi %s897_s22, %s1143_s22   ;;  %s846_s21 = sphi %s895_s21, %s1142_s21   ;;  %s842_s20 = sphi %s893_s20, %s1141_s20   ;;  %s838_s19 = sphi %s891_s19, %s1140_s19   ;;  %s834_s18 = sphi %s889_s18, %s1139_s18  }
   0xc   : > { %s34_s26 = sadd.s32 1, %s850_s22  ;;  %s113_s27 = sadd.s32 1, %s842_s20 }
   0xd   : > { %p36_p0 = scmp.ge.s32.totalorder %s34_s26, 2  ;;  %p123_p1 = scmp.ne.s32.totalorder %s842_s20, %s838_s19 }
   0xe   : > { %p124_p2 = scmp.eq.s32.totalorder %s585_s24, 1  ;;  %p129_p3 = scmp.ne.s32.totalorder %s838_s19, %s834_s18 }
   0xf   : > { %s1145_s26 = smov (%p36_p0, %s34_s26), 0  ;;  %p130_p5 = scmp.eq.s32.totalorder %s1113_s25, 1 }
  0x10   : > { %p931_p4 = por %p124_p2, %p123_p1  ;;  %s108_s29 = ssub.s32 %s850_s22, %s1145_s26 }
  0x11   : > { %p589_p6 = scmp.ge.s32.totalorder %s854_s23, 1  ;;  %p111_p7 = scmp.eq.s32.totalorder %s108_s29, 0 }
  0x12   : > { %p940_p8 = por %p130_p5, %p129_p3  ;;  %p221_p9 = scmp.lt.s32.totalorder %s854_s23, 3 }
  0x13   : > { %s946_s6 = scalar_select %p111_p7, %s842_s20, %s113_s27  }
  0x14   : > { %p222_p10 = pnand %p589_p6, %p221_p9 }
  0x16   : > { %225 = sbr.rel (%p222_p10) target bundleno = 216 (0xd8), region = 32 }
  0x1b   : > { %p262_p11 = scmp.lt.s32.totalorder %s846_s21, 1  ;;  %v856_v0 = vmov 0   ;;  %s1124_s1 = sld [smem:[#allocation12_spill]]  ;;  %vm331_vm0 = vcmask 130048  }
  0x1c   : > { %713 = vset.pattern.permute.xlu0 %v856_v0  ;;  %714 = vset.pattern.permute.xlu1 %v856_v0  ;;  %s1125_s2 = sld [smem:[#allocation13_spill]]  ;;  %s986_s29 = sshll.u32 %s846_s21, 3 }
  0x1d   : > { %s263_s11 = scalar_select %p262_p11, %s846_s21, 1  ;;  %715 = vset.pattern.permute.xlu2 %v856_v0 }
  0x1e   : > { %s1126_s0 = sld [smem:[#allocation11_spill]]  ;;  %s1000_s21 = sand.u32 1, %s585_s24  }
  0x1f   : > { %s621_s14 = sshll.u32 %s263_s11, 4  ;;  %s1129_s4 = sld [smem:[#allocation14_spill]] }
  0x20   : > { %s400_s16 = scalar_lea.hbm %s1110_s3, %s986_s29  ;;  %s436_s15 = scalar_lea.hbm %s1112_s5, %s986_s29 }
  0x21   : > { %v282_v1 = vld [vmem:[%s1124_s1 + $0x10] sm:$0xff]  ;;  %v280_v2 = vld [vmem:[%s1124_s1] sm:$0xff]  ;;  %v283_v7 = vld [vmem:[%s1124_s1 + $0x18] sm:$0xff]  ;;  %s1010_s24 = sshll.u32 %s400_s16, 4  ;;  %s404_s24 = int_to_ptr.hbm [resolvable:$true] %s1010_s24 }
  0x22   : > { %298 = vperm.xlu0 %713, %v282_v1   ;;  %288 = vperm.xlu1 %714, %v280_v2   ;;  %v284_v3 = vld [vmem:[%s1124_s1 + $0x20] sm:$0xff]  ;;  %s269_s17 = scalar_lea.vmem %s1125_s2, %s621_s14  ;;  %v281_v10 = vld [vmem:[%s1124_s1 + $0x8] sm:$0xff] }
  0x23   : > { %308 = vperm.xlu2 %715, %v284_v3   ;;  %v271_v4 = vld [vmem:[%s269_s17] sm:$0xff]  ;;  %v272_v5 = vld [vmem:[%s269_s17 + $0x8] sm:$0xff]  ;;  %s1115_s17 = sand.u32 1, %s838_s19  }
  0x24   : > { %v273_v6 = vpack.c.bf16 %v272_v5, %v271_v4  ;;  %v622_v8 = vld [vmem:[%s1126_s0] sm:$0xff]  ;;  %v623_v9 = vld [vmem:[%s1126_s0 + $0x8] sm:$0xff]  ;;  %v624_v11 = vld [vmem:[%s1126_s0 + $0x10] sm:$0xff]  ;;  %s983_s27 = sshll.u32 %s1115_s17, 3 }
  0x25   : > { %v285_v12 = vld [vmem:[%s1124_s1 + $0x28] sm:$0xff]  ;;  %s247_s7 = scalar_lea.vmem [#allocation2], %s983_s27  ;;  %s254_s9 = scalar_lea.vmem [#allocation4], %s983_s27 }
  0x26   : > { %348 = vmatpush.bf16.msra.mxu0 %v273_v6  ;;  %643 = vmatpush.bf16.msra.mxu1 %v273_v6  ;;  %s989_s8 = sshll.u32 %s247_s7, 4  ;;  %s992_s10 = sshll.u32 %s254_s9, 4 }
  0x27   : > { %644 = vmatpush.bf16.msra.mxu2 %v273_v6  ;;  %1127 = sst [smem:[#allocation9_spill]] %s989_s8  ;;  %s418_s13 = scalar_lea.hbm %s1129_s4, %s986_s29 }
  0x28   : > { %1128 = sst [smem:[#allocation10_spill]] %s992_s10  ;;  %s1008_s11 = sshll.u32 %s418_s13, 4  ;;  %s422_s11 = int_to_ptr.hbm [resolvable:$true] %s1008_s11 }
  0x29   : > { %607 = vmatmul.msk.bf16.vlgmr.msra.gmra.mxu0 %vm331_vm0, %v622_v8  ;;  %608 = vmatmul.msk.bf16.vlgmr.msra.gmra.mxu1 %vm331_vm0, %v623_v9  ;;  %s1117_s25 = scalar_lea.vmem [#allocation6], %s983_s27  ;;  %s1023_s13 = sshll.u32 %s436_s15, 4  ;;  %s440_s13 = int_to_ptr.hbm [resolvable:$true] %s1023_s13 }
  0x2a   : > { %303 = vperm.xlu0 %713, %v283_v7   ;;  %293 = vperm.xlu1 %714, %v281_v10   ;;  %s1021_s8 = sshll.u32 %s1117_s25, 4  ;;  %s730_s17 = sshra.s32 %s422_s11, 4  ;;  %s731_s17 = int_to_ptr.hbm [resolvable:$true] %s730_s17  ;;  %s438_s8 = int_to_ptr.vmem [resolvable:$true] %s1021_s8 }
  0x2b   : > { %609 = vmatmul.msk.bf16.vlgmr.msra.gmra.mxu2 %vm331_vm0, %v624_v11  ;;  %313 = vperm.xlu2 %715, %v285_v12   ;;  %s732_s10 = scalar_lea.hbm %s731_s17, 8  ;;  %p737_p1 = scmp.lt.s32.totalorder %s731_s17, %s1129_s4 }
  0x2c   : > { %p733_p12 = scmp.ne.s32.totalorder %s731_s17, %s732_s10 }
  0x2e   : > { %p734_p13 = pnand %p733_p12, %p931_p4 }
  0x30   : > { %p735_p0 = pneg %p734_p13 }
  0x7d   : > { %v309_v17 = vpop.permute.xlu2 %308 }
  0x85   : > { %v314_v29 = vpop.permute.xlu2 %313 }
  0x94   : > { %v299_v13 = vpop.permute.xlu0 %298  ;;  %v289_v14 = vpop.permute.xlu1 %288 }
  0x9c   : > { %v304_v18 = vpop.permute.xlu0 %303  ;;  %v294_v19 = vpop.permute.xlu1 %293 }
  0xa6   : > { %v350_v15 = vpop.f32.mrf.mxu0  ;;  %v355_v16 = vpop.f32.mrf.mxu1 }
  0xa7   : > { %v351_v23 = vadd.f32 %v350_v15, %v289_v14  ;;  %v356_v24 = vadd.f32 %v355_v16, %v299_v13 }
  0xae   : > { %v360_v20 = vpop.f32.mrf.mxu2  ;;  %v352_v21 = vpop.f32.mrf.mxu0 }
  0xaf   : > { %v357_v22 = vpop.f32.mrf.mxu1  ;;  %v353_v25 = vadd.f32 %v352_v21, %v294_v19 }
  0xb0   : > { %v358_v26 = vadd.f32 %v357_v22, %v304_v18 }
  0xb1   : > { %v631_v27 = vpack.c.bf16 %v353_v25, %v351_v23 }
  0xb2   : > { %v636_v28 = vpack.c.bf16 %v358_v26, %v356_v24 }
  0xb3   : > { %632 = vst [vmem:[%s247_s7] sm:$0xff] %v631_v27  }
  0xb4   : > { %637 = vst [vmem:[%s254_s9] sm:$0xff] %v636_v28   ;;  %s736_s9 = scalar_lea.hbm %s1129_s4, 16 }
  0xb5   : > { %p738_p2 = scmp.lt.s32.totalorder %s736_s9, %s732_s10 }
  0xb6   : > { %v362_v30 = vpop.f32.mrf.mxu2 }
  0xb7   : > { %p739_p3 = por %p738_p2, %p737_p1 }
  0xb9   : > { %p740_p5 = pnand %p739_p3, %p735_p0 }
  0xbb   : > { %743 = shalt.err (!%p740_p5)
}
  0xbc   : > { %s857_s15 = smov 64   ;;  %s1130_s25 = sld [smem:[#allocation10_spill]]  ;;  %v361_v31 = vadd.f32 %v360_v20, %v309_v17  ;;  %v363_v32 = vadd.f32 %v362_v30, %v314_v29 }
  0xbd   : > { %s858_s16 = smov 4   ;;  %s1131_s29 = scalar_lea.sflag [#allocation5], %s1000_s21 }
  0xbe   : > { %s1133_s17 = sand.u32 1, %s838_s19   ;;  %s758_s9 = sshra.s32 %s404_s24, 4  ;;  %s759_s9 = int_to_ptr.hbm [resolvable:$true] %s758_s9 }
  0xbf   : > { %s378_s10 = scalar_lea.sflag [#allocation3], %s1133_s17  ;;  %s760_s12 = scalar_lea.hbm %s759_s9, 8 }
  0xc0   : > { %p761_p6 = scmp.ne.s32.totalorder %s759_s9, %s760_s12  ;;  %s764_s1 = scalar_lea.hbm %s1110_s3, 16 }
  0xc1   : > { %p765_p10 = scmp.lt.s32.totalorder %s759_s9, %s1110_s3  ;;  %p766_p11 = scmp.lt.s32.totalorder %s764_s1, %s760_s12 }
  0xc2   : > { %s1132_s7 = int_to_ptr.vmem [resolvable:$true] %s1130_s25  ;;  %p762_p7 = pnand %p761_p6, %p931_p4 }
  0xc3   : > { %646 = dma.vmem_to_hbm [thread:$0]  (%p931_p4), %s1132_s7, 128, %s422_s11, %s1131_s29, %s857_s15, %s857_s15, %s858_s16  }
  0xc4   : > { %p763_p9 = pneg %p762_p7  ;;  %p767_p12 = por %p766_p11, %p765_p10 }
  0xc6   : > { %p768_p13 = pnand %p767_p12, %p763_p9 }
  0xc8   : > { %771 = shalt.err (!%p768_p13)
}
  0xc9   : > { %s1134_s25 = sld [smem:[#allocation9_spill]]  ;;  %v641_v33 = vpack.c.bf16 %v363_v32, %v361_v31  ;;  %s1136_s0 = scalar_lea.vmem [#allocation6], %s983_s27 }
  0xca   : > { %s786_s1 = sshra.s32 %s440_s13, 4  ;;  %s792_s7 = scalar_lea.hbm %s1112_s5, 16  ;;  %s787_s1 = int_to_ptr.hbm [resolvable:$true] %s786_s1 }
  0xcb   : > { %642 = vst [vmem:[%s1136_s0] sm:$0xff] %v641_v33   ;;  %s788_s2 = scalar_lea.hbm %s787_s1, 8  ;;  %p793_p3 = scmp.lt.s32.totalorder %s787_s1, %s1112_s5 }
  0xcc   : > { %p789_p0 = scmp.ne.s32.totalorder %s787_s1, %s788_s2  ;;  %p794_p5 = scmp.lt.s32.totalorder %s792_s7, %s788_s2 }
  0xce   : > { %p790_p1 = pnand %p789_p0, %p931_p4  ;;  %p795_p6 = por %p794_p5, %p793_p3 }
  0xcf   : > { %s1135_s11 = int_to_ptr.vmem [resolvable:$true] %s1134_s25 }
  0xd0   : > { %645 = dma.vmem_to_hbm [thread:$0]  (%p931_p4), %s1135_s11, 128, %s404_s24, %s378_s10, %s857_s15, %s857_s15, %s858_s16  }
  0xd1   : > { %p791_p2 = pneg %p790_p1 }
  0xd3   : > { %p796_p7 = pnand %p795_p6, %p791_p2 }
  0xd5   : > { %799 = shalt.err (!%p796_p7)
}
  0xd6   : > { %s1137_s27 = scalar_lea.sflag [#allocation5], %s1000_s21 }
  0xd7   : > { %647 = dma.vmem_to_hbm [thread:$0]  (%p931_p4), %s438_s8, 128, %s440_s13, %s1137_s27, %s857_s15, %s857_s15, %s858_s16  }
  0xd8 PF: > { %p661_p9 = scmp.ge.s32.totalorder %s854_s23, 2  ;;  %s454_s24 = sand.u32 1, %s834_s18  }
  0xd9   : > { %s455_s10 = scalar_lea.sflag [#allocation3], %s454_s24 }
  0xda   : > { %p652_p10 = pnand %p661_p9, %p940_p8 }
  0xdc   : > { %p653_p11 = pneg %p652_p10 }
  0xde   : > { %825 = dma.done.wait (%p653_p11), %s455_s10, 128  }
  0xdf   : > { %827 = vsyncadd (%p653_p11), %s455_s10, 4294967168  ;;  %s1138_s28 = sadd.s32 4294967294, %s854_s23  }
  0xe0   : > { %s464_s12 = sand.u32 1, %s1138_s28  }
  0xe1   : > { %s465_s14 = scalar_lea.sflag [#allocation5], %s464_s12 }
  0xe2   : > { %829 = dma.done.wait (%p653_p11), %s465_s14, 256  }
  0xe3   : > { %831 = vsyncadd (%p653_p11), %s465_s14, 4294967040  ;;  %s22_s23 = sadd.s32 1, %s854_s23   ;;  %s1139_s18 = smov %s838_s19 }
  0xe4   : > { %p19_p4 = scmp.ge.s32.totalorder %s22_s23, 4   ;;  %s1140_s19 = smov %s842_s20 }
  0xe5   : > { %s1141_s20 = smov %s946_s6  ;;  %s1142_s21 = smov %s850_s22 }
  0xe6   : > { %s1143_s22 = smov %s1145_s26  ;;  %21 = sbr.rel (!%p19_p4) target bundleno = 11 (0xb), region = 99 }
  0xeb   :  { %481 = vsyncpa [#allocation3], 1 }
  0xec   :  { %483 = vsyncpa [#allocation3 + $0x1], 1 }
  0xed   :  { %484 = vsyncpa [#allocation5], 1 }
  0xee   :  { %486 = vsyncpa [#allocation5 + $0x1], 1 }

</bundles_post_ra>
